<compile_context>
chip_gen: v7x
topology: tpu7x:2x2x1
jax: 0.10.0
libtpu: 0.0.40
codegen_flags: <defaults>
</compile_context>

<pallas_src>
import functools

import jax
import jax.numpy as jnp
from jax.experimental import pallas as pl

FC1_UNITS = 64
FC2_UNITS = 64
OUT_PAD = 128          # lane-dense padded width of the fc3 output
BN_EPS = 1e-5


def _bn_relu(h, gamma, beta):
    """Training-mode BatchNorm1d with the affine folded into one FMA, then ReLU."""
    mean = jnp.mean(h, axis=0, keepdims=True)
    var = jnp.mean((h - mean) * (h - mean), axis=0, keepdims=True)
    scale = jax.lax.rsqrt(var + BN_EPS) * gamma          # (1, C)
    shift = beta - mean * scale                          # (1, C)
    return jnp.maximum(h * scale + shift, 0.0)


def qnetwork_kernel(x_ref, w1_ref, w2_ref, w3_ref, vec_ref, out_ref):
    x = x_ref[...]

    # One packed (8, 128) tile holds all small per-channel vectors.
    vec = vec_ref[...]
    g1 = vec[0:1, :FC1_UNITS]
    be1 = vec[1:2, :FC1_UNITS]
    g2 = vec[2:3, :FC2_UNITS]
    be2 = vec[3:4, :FC2_UNITS]
    b3 = vec[4:5, :]                                     # (1, OUT_PAD), zero-padded

    # fc1 (bias dropped: cancelled exactly by BN mean subtraction) -> bn1 -> relu
    h1 = jnp.dot(x, w1_ref[...], preferred_element_type=jnp.float32)
    h1 = _bn_relu(h1, g1, be1)

    # fc2 (bias dropped) -> bn2 -> relu
    h2 = jnp.dot(h1, w2_ref[...], preferred_element_type=jnp.float32)
    h2 = _bn_relu(h2, g2, be2)

    # fc3, lane-dense padded to OUT_PAD columns (padding columns of w3/b3 are 0).
    out = jnp.dot(h2, w3_ref[...], preferred_element_type=jnp.float32) + b3
    out_ref[...] = out.astype(out_ref.dtype)


@functools.partial(jax.jit, static_argnames=("action_size",))
def qnetwork_forward(x, w1, w2, w3p, vec, *, action_size):
    """x: (B, state_size) f32.  w3p: (FC2, OUT_PAD) padded.  vec: (8, OUT_PAD) packed.
    Returns (B, action_size) f32."""
    B = x.shape[0]
    args = (x, w1, w2, w3p, vec)

    def full_spec(a):
        # Whole (small) array resident in VMEM; single grid step.
        return pl.BlockSpec(a.shape, lambda: (0,) * a.ndim)

    out_padded = pl.pallas_call(
        qnetwork_kernel,
        out_shape=jax.ShapeDtypeStruct((B, OUT_PAD), jnp.float32),
        grid=(),
        in_specs=[full_spec(a) for a in args],
        out_specs=pl.BlockSpec((B, OUT_PAD), lambda: (0, 0)),
    )(*args)
    # Strip the lane padding outside the kernel (cheap XLA slice).
    return out_padded[:, :action_size]


def init_params(key, state_size, action_size):
    """Deterministic init mimicking torch.nn.Linear (uniform +/- 1/sqrt(fan_in));
    BatchNorm gamma=1, beta=0.  Weights stored pre-transposed as (in, out)."""
    ks = jax.random.split(key, 6)

    def linear(kw, kb, fan_in, fan_out):
        bound = 1.0 / jnp.sqrt(jnp.float32(fan_in))
        w = jax.random.uniform(kw, (fan_in, fan_out), jnp.float32, -bound, bound)
        b = jax.random.uniform(kb, (1, fan_out), jnp.float32, -bound, bound)
        return w, b

    w1, b1 = linear(ks[0], ks[1], state_size, FC1_UNITS)
    w2, b2 = linear(ks[2], ks[3], FC1_UNITS, FC2_UNITS)
    w3, b3 = linear(ks[4], ks[5], FC2_UNITS, action_size)

    return {
        "w1": w1, "b1": b1,
        "g1": jnp.ones((1, FC1_UNITS), jnp.float32),
        "be1": jnp.zeros((1, FC1_UNITS), jnp.float32),
        "w2": w2, "b2": b2,
        "g2": jnp.ones((1, FC2_UNITS), jnp.float32),
        "be2": jnp.zeros((1, FC2_UNITS), jnp.float32),
        "w3": w3, "b3": b3,
    }


def pack_params(params):
    """One-time packing for the kernel:
      - drop b1/b2 (exactly cancelled by training-mode BN),
      - pad fc3 weight/bias to a lane-dense OUT_PAD=128 columns,
      - pack g1/be1/g2/be2/b3 into a single (8, OUT_PAD) tile (one DMA)."""
    action_size = params["w3"].shape[1]

    w3p = jnp.zeros((FC2_UNITS, OUT_PAD), jnp.float32)
    w3p = w3p.at[:, :action_size].set(params["w3"])

    vec = jnp.zeros((8, OUT_PAD), jnp.float32)
    vec = vec.at[0, :FC1_UNITS].set(params["g1"].reshape(-1))
    vec = vec.at[1, :FC1_UNITS].set(params["be1"].reshape(-1))
    vec = vec.at[2, :FC2_UNITS].set(params["g2"].reshape(-1))
    vec = vec.at[3, :FC2_UNITS].set(params["be2"].reshape(-1))
    vec = vec.at[4, :action_size].set(params["b3"].reshape(-1))

    return params["w1"], params["w2"], w3p, vec, action_size


def reference_forward(x, params):
    """Pure-JAX reference of the original PyTorch math (biases included,
    un-folded BatchNorm) for the correctness check."""
    h = x @ params["w1"] + params["b1"]
    m = h.mean(0, keepdims=True); v = ((h - m) ** 2).mean(0, keepdims=True)
    h = jnp.maximum((h - m) / jnp.sqrt(v + BN_EPS) * params["g1"] + params["be1"], 0.0)
    h = h @ params["w2"] + params["b2"]
    m = h.mean(0, keepdims=True); v = ((h - m) ** 2).mean(0, keepdims=True)
    h = jnp.maximum((h - m) / jnp.sqrt(v + BN_EPS) * params["g2"] + params["be2"], 0.0)
    return h @ params["w3"] + params["b3"]


if __name__ == "__main__":
    key = jax.random.PRNGKey(0)
    k_x, k_p = jax.random.split(key)

    B, STATE_SIZE, ACTION_SIZE = 8, 8, 4
    x = jax.random.normal(k_x, (B, STATE_SIZE), jnp.float32)
    params = init_params(k_p, STATE_SIZE, ACTION_SIZE)

    # Pack / pad once; repeated forward calls reuse the packed arrays.
    w1, w2, w3p, vec, action_size = pack_params(params)

    out = qnetwork_forward(x, w1, w2, w3p, vec, action_size=action_size)
    out = jax.block_until_ready(out)

    ref = reference_forward(x, params)
    assert out.shape == (B, ACTION_SIZE)
    assert jnp.allclose(out, ref, atol=1e-4, rtol=1e-4), "mismatch vs reference"

    print("KERNEL_OK")
</pallas_src>

<mosaic_0001>
module attributes {stable_mosaic.version = 11 : i64} {
  func.func @qnetwork_kernel(%arg0: memref<8x8xf32, #tpu.memory_space<vmem>>, %arg1: memref<8x64xf32, #tpu.memory_space<vmem>>, %arg2: memref<64x64xf32, #tpu.memory_space<vmem>>, %arg3: memref<64x128xf32, #tpu.memory_space<vmem>>, %arg4: memref<8x128xf32, #tpu.memory_space<vmem>>, %arg5: memref<8x128xf32, #tpu.memory_space<vmem>>) attributes {dimension_semantics = [], scalar_prefetch = 0 : i64, scratch_operands = 0 : i64, tpu.core_type = #tpu.core_type<tc>} {
    %c0 = arith.constant 0 : index
    %c0_0 = arith.constant 0 : index
    %0 = vector.load %arg0[%c0, %c0_0] : memref<8x8xf32, #tpu.memory_space<vmem>>, vector<8x8xf32>
    %c0_1 = arith.constant 0 : index
    %c0_2 = arith.constant 0 : index
    %1 = vector.load %arg4[%c0_1, %c0_2] : memref<8x128xf32, #tpu.memory_space<vmem>>, vector<8x128xf32>
    %2 = vector.extract_strided_slice %1 {offsets = [0, 0], sizes = [1, 64], strides = [1, 1]} : vector<8x128xf32> to vector<1x64xf32>
    %3 = vector.extract_strided_slice %1 {offsets = [1, 0], sizes = [1, 64], strides = [1, 1]} : vector<8x128xf32> to vector<1x64xf32>
    %4 = vector.extract_strided_slice %1 {offsets = [2, 0], sizes = [1, 64], strides = [1, 1]} : vector<8x128xf32> to vector<1x64xf32>
    %5 = vector.extract_strided_slice %1 {offsets = [3, 0], sizes = [1, 64], strides = [1, 1]} : vector<8x128xf32> to vector<1x64xf32>
    %6 = vector.extract_strided_slice %1 {offsets = [4, 0], sizes = [1, 128], strides = [1, 1]} : vector<8x128xf32> to vector<1x128xf32>
    %c0_3 = arith.constant 0 : index
    %c0_4 = arith.constant 0 : index
    %7 = vector.load %arg1[%c0_3, %c0_4] : memref<8x64xf32, #tpu.memory_space<vmem>>, vector<8x64xf32>
    %cst = arith.constant dense<0.000000e+00> : vector<8x64xf32>
    %8 = tpu.matmul %0, %7, %cst {dimension_numbers = #tpu.dot_dimension_numbers<[1], [0], [0], [1], [0, 0, 1, 1], [], []>} : vector<8x8xf32>, vector<8x64xf32>, vector<8x64xf32> -> vector<8x64xf32>
    %cst_5 = arith.constant dense<0.000000e+00> : vector<64xf32>
    %9 = vector.multi_reduction <add>, %8, %cst_5 [0] : vector<8x64xf32> to vector<64xf32>
    %10 = vector.shape_cast %9 : vector<64xf32> to vector<1x64xf32>
    %cst_6 = arith.constant 8.000000e+00 : f32
    %11 = vector.broadcast %cst_6 : f32 to vector<1x64xf32>
    %12 = arith.divf %10, %11 : vector<1x64xf32>
    %13 = vector.broadcast %12 : vector<1x64xf32> to vector<8x64xf32>
    %14 = arith.subf %8, %13 : vector<8x64xf32>
    %15 = vector.broadcast %12 : vector<1x64xf32> to vector<8x64xf32>
    %16 = arith.subf %8, %15 : vector<8x64xf32>
    %17 = arith.mulf %14, %16 : vector<8x64xf32>
    %cst_7 = arith.constant dense<0.000000e+00> : vector<64xf32>
    %18 = vector.multi_reduction <add>, %17, %cst_7 [0] : vector<8x64xf32> to vector<64xf32>
    %19 = vector.shape_cast %18 : vector<64xf32> to vector<1x64xf32>
    %cst_8 = arith.constant 8.000000e+00 : f32
    %20 = vector.broadcast %cst_8 : f32 to vector<1x64xf32>
    %21 = arith.divf %19, %20 : vector<1x64xf32>
    %cst_9 = arith.constant 9.99999974E-6 : f32
    %22 = vector.broadcast %cst_9 : f32 to vector<1x64xf32>
    %23 = arith.addf %21, %22 : vector<1x64xf32>
    %24 = math.rsqrt %23 : vector<1x64xf32>
    %25 = arith.mulf %24, %2 : vector<1x64xf32>
    %26 = arith.mulf %12, %25 : vector<1x64xf32>
    %27 = arith.subf %3, %26 : vector<1x64xf32>
    %28 = vector.broadcast %25 : vector<1x64xf32> to vector<8x64xf32>
    %29 = arith.mulf %8, %28 : vector<8x64xf32>
    %30 = vector.broadcast %27 : vector<1x64xf32> to vector<8x64xf32>
    %31 = arith.addf %29, %30 : vector<8x64xf32>
    %cst_10 = arith.constant 0.000000e+00 : f32
    %32 = vector.broadcast %cst_10 : f32 to vector<8x64xf32>
    %33 = arith.maximumf %31, %32 : vector<8x64xf32>
    %c0_11 = arith.constant 0 : index
    %c0_12 = arith.constant 0 : index
    %34 = vector.load %arg2[%c0_11, %c0_12] : memref<64x64xf32, #tpu.memory_space<vmem>>, vector<64x64xf32>
    %cst_13 = arith.constant dense<0.000000e+00> : vector<8x64xf32>
    %35 = tpu.matmul %33, %34, %cst_13 {dimension_numbers = #tpu.dot_dimension_numbers<[1], [0], [0], [1], [0, 0, 1, 1], [], []>} : vector<8x64xf32>, vector<64x64xf32>, vector<8x64xf32> -> vector<8x64xf32>
    %cst_14 = arith.constant dense<0.000000e+00> : vector<64xf32>
    %36 = vector.multi_reduction <add>, %35, %cst_14 [0] : vector<8x64xf32> to vector<64xf32>
    %37 = vector.shape_cast %36 : vector<64xf32> to vector<1x64xf32>
    %cst_15 = arith.constant 8.000000e+00 : f32
    %38 = vector.broadcast %cst_15 : f32 to vector<1x64xf32>
    %39 = arith.divf %37, %38 : vector<1x64xf32>
    %40 = vector.broadcast %39 : vector<1x64xf32> to vector<8x64xf32>
    %41 = arith.subf %35, %40 : vector<8x64xf32>
    %42 = vector.broadcast %39 : vector<1x64xf32> to vector<8x64xf32>
    %43 = arith.subf %35, %42 : vector<8x64xf32>
    %44 = arith.mulf %41, %43 : vector<8x64xf32>
    %cst_16 = arith.constant dense<0.000000e+00> : vector<64xf32>
    %45 = vector.multi_reduction <add>, %44, %cst_16 [0] : vector<8x64xf32> to vector<64xf32>
    %46 = vector.shape_cast %45 : vector<64xf32> to vector<1x64xf32>
    %cst_17 = arith.constant 8.000000e+00 : f32
    %47 = vector.broadcast %cst_17 : f32 to vector<1x64xf32>
    %48 = arith.divf %46, %47 : vector<1x64xf32>
    %cst_18 = arith.constant 9.99999974E-6 : f32
    %49 = vector.broadcast %cst_18 : f32 to vector<1x64xf32>
    %50 = arith.addf %48, %49 : vector<1x64xf32>
    %51 = math.rsqrt %50 : vector<1x64xf32>
    %52 = arith.mulf %51, %4 : vector<1x64xf32>
    %53 = arith.mulf %39, %52 : vector<1x64xf32>
    %54 = arith.subf %5, %53 : vector<1x64xf32>
    %55 = vector.broadcast %52 : vector<1x64xf32> to vector<8x64xf32>
    %56 = arith.mulf %35, %55 : vector<8x64xf32>
    %57 = vector.broadcast %54 : vector<1x64xf32> to vector<8x64xf32>
    %58 = arith.addf %56, %57 : vector<8x64xf32>
    %cst_19 = arith.constant 0.000000e+00 : f32
    %59 = vector.broadcast %cst_19 : f32 to vector<8x64xf32>
    %60 = arith.maximumf %58, %59 : vector<8x64xf32>
    %c0_20 = arith.constant 0 : index
    %c0_21 = arith.constant 0 : index
    %61 = vector.load %arg3[%c0_20, %c0_21] : memref<64x128xf32, #tpu.memory_space<vmem>>, vector<64x128xf32>
    %cst_22 = arith.constant dense<0.000000e+00> : vector<8x128xf32>
    %62 = tpu.matmul %60, %61, %cst_22 {dimension_numbers = #tpu.dot_dimension_numbers<[1], [0], [0], [1], [0, 0, 1, 1], [], []>} : vector<8x64xf32>, vector<64x128xf32>, vector<8x128xf32> -> vector<8x128xf32>
    %63 = vector.broadcast %6 : vector<1x128xf32> to vector<8x128xf32>
    %64 = arith.addf %62, %63 : vector<8x128xf32>
    %c0_23 = arith.constant 0 : index
    %c0_24 = arith.constant 0 : index
    %65 = vector.load %arg5[%c0_23, %c0_24] : memref<8x128xf32, #tpu.memory_space<vmem>>, vector<8x128xf32>
    tpu.vector_store %arg5[%c0_23, %c0_24], %64 {strides = array<i32>} : memref<8x128xf32, #tpu.memory_space<vmem>>, vector<8x128xf32>,
    return
  }
}

</mosaic_0001>

<bundles_post_ra>
// kernel: qnetwork_forward.1
= control target key start
LH: loop header
LB: loop body
LE: loop exit
PB: predicated region body
PF: predicated region fallthrough
CT: control target
= control target key end

     0   :  { %10 = vsyncpa [#allocation3], 0  ;;  %s716_s0 = inlined_call_operand.hbm [shape: f32[8,8], index: 0, kind: input, shape index: {}]   ;;  %s717_s1 = inlined_call_operand.hbm [shape: f32[8,64], index: 1, kind: input, shape index: {}]   ;;  %s718_s2 = inlined_call_operand.hbm [shape: f32[64,64], index: 2, kind: input, shape index: {}]   ;;  %s719_s3 = inlined_call_operand.hbm [shape: f32[64,128], index: 3, kind: input, shape index: {}]   ;;  %s720_s4 = inlined_call_operand.vmem [shape: f32[8,128], index: 4, kind: input, shape index: {}]   ;;  %s721_s5 = inlined_call_operand.vmem [shape: f32[8,128], index: 5, kind: output, shape index: {}]  }
   0x1   :  { %11 = vsyncpa [#allocation5], 0 }
   0x2   :  { %12 = vsyncpa [#allocation8], 0  ;;  %s595_s18 = smov [#allocation4]   ;;  %s596_s20 = smov [#allocation2]  }
   0x3   :  { %s29_s19 = sshll.u32 %s595_s18, 4  ;;  %s19_s21 = sshll.u32 %s596_s20, 4  ;;  %s30_s19 = int_to_ptr.vmem [resolvable:$true] %s29_s19  ;;  %s20_s21 = int_to_ptr.vmem [resolvable:$true] %s19_s21 }
   0x4   :  { %s501_s24 = scalar_lea.hbm %s717_s1, 128 }
   0x5   :  { %p502_p0 = scmp.ne.s32.totalorder %s717_s1, %s501_s24  ;;  %p505_p1 = scmp.lt.u32.totalorder %s501_s24, %s717_s1 }
   0x7   :  { %p507_p2 = pnand %p505_p1, %p502_p0 }
   0x9   :  { %510 = shalt.err (!%p507_p2)
}
   0xa   :  { %s511_s29 = scalar_lea.vmem %s30_s19, 128  ;;  %p516_p4 = scmp.lt.s32.totalorder %s30_s19, %s30_s19 }
   0xb   :  { %p512_p3 = scmp.ne.s32.totalorder %s30_s19, %s511_s29  ;;  %p517_p5 = scmp.lt.s32.totalorder %s511_s29, %s511_s29 }
   0xd   :  { %p518_p6 = por %p517_p5, %p516_p4 }
   0xf   :  { %p519_p7 = pnand %p518_p6, %p512_p3 }
  0x11   :  { %522 = shalt.err (!%p519_p7)
}
  0x12   :  { %32 = dma.hbm_to_vmem [thread:$0]  %s717_s1, 128, %s30_s19, [#allocation5]  }
  0x13   :  { %s523_s9 = scalar_lea.hbm %s716_s0, 128 }
  0x14   :  { %p524_p8 = scmp.ne.s32.totalorder %s716_s0, %s523_s9  ;;  %p527_p9 = scmp.lt.u32.totalorder %s523_s9, %s716_s0 }
  0x16   :  { %p529_p10 = pnand %p527_p9, %p524_p8 }
  0x18   :  { %532 = shalt.err (!%p529_p10)
}
  0x19   :  { %s533_s14 = scalar_lea.vmem %s20_s21, 128  ;;  %p538_p12 = scmp.lt.s32.totalorder %s20_s21, %s20_s21 }
  0x1a   :  { %p534_p11 = scmp.ne.s32.totalorder %s20_s21, %s533_s14  ;;  %p539_p13 = scmp.lt.s32.totalorder %s533_s14, %s533_s14 }
  0x1c   :  { %p540_p0 = por %p539_p13, %p538_p12 }
  0x1e   :  { %p541_p1 = pnand %p540_p0, %p534_p11 }
  0x20   :  { %544 = shalt.err (!%p541_p1)
}
  0x21   :  { %22 = dma.hbm_to_vmem [thread:$0]  %s716_s0, 128, %s20_s21, [#allocation3]  }
  0x22   :  { %s597_s16 = smov [#allocation6]   ;;  %s545_s20 = scalar_lea.hbm %s718_s2, 1024 }
  0x23   :  { %s38_s17 = sshll.u32 %s597_s16, 4  ;;  %p546_p2 = scmp.ne.s32.totalorder %s718_s2, %s545_s20  ;;  %s39_s17 = int_to_ptr.vmem [resolvable:$true] %s38_s17 }
  0x24   :  { %p549_p3 = scmp.lt.u32.totalorder %s545_s20, %s718_s2 }
  0x26   :  { %p551_p4 = pnand %p549_p3, %p546_p2 }
  0x28   :  { %554 = shalt.err (!%p551_p4)
}
  0x29   :  { %s555_s26 = scalar_lea.vmem %s39_s17, 1024  ;;  %p560_p6 = scmp.lt.s32.totalorder %s39_s17, %s39_s17 }
  0x2a   :  { %p556_p5 = scmp.ne.s32.totalorder %s39_s17, %s555_s26  ;;  %p561_p7 = scmp.lt.s32.totalorder %s555_s26, %s555_s26 }
  0x2c   :  { %p562_p8 = por %p561_p7, %p560_p6 }
  0x2e   :  { %p563_p9 = pnand %p562_p8, %p556_p5 }
  0x30   :  { %566 = shalt.err (!%p563_p9)
}
  0x31   :  { %s598_s0 = smov 128   ;;  %s599_s21 = smov 8  }
  0x32   :  { %44 = dma.hbm_to_vmem [thread:$0]  %s718_s2, 1024, %s39_s17, [#allocation5], %s598_s0, %s598_s0, %s599_s21  }
  0x33   :  { %s600_s29 = smov [#allocation7]   ;;  %s567_s8 = scalar_lea.hbm %s719_s3, 1024 }
  0x34   :  { %s50_s30 = sshll.u32 %s600_s29, 4  ;;  %p568_p10 = scmp.ne.s32.totalorder %s719_s3, %s567_s8  ;;  %s51_s30 = int_to_ptr.vmem [resolvable:$true] %s50_s30 }
  0x35   :  { %p571_p11 = scmp.lt.u32.totalorder %s567_s8, %s719_s3 }
  0x37   :  { %p573_p12 = pnand %p571_p11, %p568_p10 }
  0x39   :  { %576 = shalt.err (!%p573_p12)
}
  0x3a   :  { %s577_s13 = scalar_lea.vmem %s51_s30, 1024  ;;  %p582_p0 = scmp.lt.s32.totalorder %s51_s30, %s51_s30 }
  0x3b   :  { %p578_p13 = scmp.ne.s32.totalorder %s51_s30, %s577_s13  ;;  %p583_p1 = scmp.lt.s32.totalorder %s577_s13, %s577_s13 }
  0x3d   :  { %p584_p2 = por %p583_p1, %p582_p0 }
  0x3f   :  { %p585_p3 = pnand %p584_p2, %p578_p13 }
  0x41   :  { %588 = shalt.err (!%p585_p3)
}
  0x42   :  { %56 = dma.hbm_to_vmem [thread:$0]  %s719_s3, 1024, %s51_s30, [#allocation8], %s598_s0, %s598_s0, %s599_s21  }
  0x43   :  { %589 = dma.done.wait [#allocation3], 128  }
  0x44   :  { %590 = vsyncadd [#allocation3], 4294967168 }
  0x45   :  { %591 = dma.done.wait [#allocation5], 1152  }
  0x46   :  { %592 = vsyncadd [#allocation5], 4294966144 }
  0x47   :  { %593 = dma.done.wait [#allocation8], 1024  }
  0x48   :  { %594 = vsyncadd [#allocation8], 4294966272  ;;  %v601_v0 = vmov 0.0   ;;  %vm602_vm0 = vmmov 0   ;;  %vm74_vm1 = vcmask 64512   ;;  %v73_v1 = vld [vmem:[#allocation4] sm:$0xff]  ;;  %v176_v37 = vlaneseq }
  0x49   :  { %421 = vmatprep.subr.mxu0 %v601_v0  ;;  %423 = vmatprep.mubr.msk.f32.mxu0 %vm602_vm0, %v601_v0  ;;  %v71_v2 = vld [vmem:[#allocation2] sm:$0xff]  ;;  %v187_v3 = vld [vmem:[#allocation6] sm:$0xff]  ;;  %v188_v4 = vld [vmem:[#allocation6 + $0x8] sm:$0xff]  ;;  %v603_v6 = vmov 0.0|0.0   ;;  %vm148_vm2 = vcmask 523264  }
  0x4a   :  { %442 = vmatprep.mubr.msk.f32.mxu1 %vm602_vm0, %v601_v0  ;;  %422 = vmatpush3.msra.mxu0 %v73_v1  ;;  %v465_v5 = vpack.c.bf16 %v188_v4, %v187_v3  ;;  %v189_v7 = vld [vmem:[#allocation6 + $0x10] sm:$0xff]  ;;  %v190_v8 = vld [vmem:[#allocation6 + $0x18] sm:$0xff]  ;;  %v191_v10 = vld [vmem:[#allocation6 + $0x20] sm:$0xff]  ;;  %v689_v38 = vshrl.u32 %v176_v37, 7 }
  0x4b   :  { %424 = vmatmul.mubr.msk.f32.vlgmr.msra.gmra.mrb[0].mxu0 %vm74_vm1, %v71_v2  ;;  %464 = vmatprep.subr.bf16.mxu1 %v603_v6  ;;  %v468_v9 = vpack.c.bf16 %v190_v8, %v189_v7  ;;  %v192_v11 = vld [vmem:[#allocation6 + $0x28] sm:$0xff]  ;;  %v193_v13 = vld [vmem:[#allocation6 + $0x30] sm:$0xff]  ;;  %v194_v14 = vld [vmem:[#allocation6 + $0x38] sm:$0xff] }
  0x4c   :  { %461 = vmatprep.mubr.msk.f32.mxu0 %vm602_vm0, %v601_v0  ;;  %476 = vmatprep.subr.bf16.mxu0 %v603_v6  ;;  %v471_v12 = vpack.c.bf16 %v192_v11, %v191_v10  ;;  %v474_v15 = vpack.c.bf16 %v194_v14, %v193_v13  ;;  %v694_v39 = vld [vmem:[%s720_s4] sm:$0xff]  ;;  %v178_v42 = vsub.s32 0, %v689_v38  ;;  %v183_v46 = vsub.s32 1, %v689_v38  ;;  %v305_v52 = vld [vmem:[#allocation7] sm:$0xff]  ;;  %v306_v53 = vld [vmem:[#allocation7 + $0x8] sm:$0xff] }
  0x4d   :  { %466 = vmatpush3.bf16.msra.mxu1 %v465_v5  ;;  %v477_v54 = vpack.c.bf16 %v306_v53, %v305_v52  ;;  %v307_v55 = vld [vmem:[#allocation7 + $0x10] sm:$0xff]  ;;  %v308_v56 = vld [vmem:[#allocation7 + $0x18] sm:$0xff]  ;;  %v309_v58 = vld [vmem:[#allocation7 + $0x20] sm:$0xff] }
  0x4e   :  { %467 = vmatprep.subr.bf16.mxu1 %v603_v6  ;;  %v480_v57 = vpack.c.bf16 %v308_v56, %v307_v55  ;;  %v310_v59 = vld [vmem:[#allocation7 + $0x28] sm:$0xff]  ;;  %v311_v61 = vld [vmem:[#allocation7 + $0x30] sm:$0xff]  ;;  %v312_v62 = vld [vmem:[#allocation7 + $0x38] sm:$0xff] }
  0x4f   :  { %478 = vmatpush3.bf16.msra.mxu0 %v477_v54  ;;  %v483_v60 = vpack.c.bf16 %v310_v59, %v309_v58  ;;  %v486_v63 = vpack.c.bf16 %v312_v62, %v311_v61 }
  0x50   :  { %479 = vmatprep.subr.bf16.mxu0 %v603_v6 }
  0x51   :  { %469 = vmatpush3.bf16.msra.mxu1 %v468_v9 }
  0x52   :  { %470 = vmatprep.subr.bf16.mxu1 %v603_v6 }
  0x53   :  { %481 = vmatpush3.bf16.msra.mxu0 %v480_v57 }
  0x54   :  { %482 = vmatprep.subr.bf16.mxu0 %v603_v6 }
  0x55   :  { %472 = vmatpush3.bf16.msra.mxu1 %v471_v12 }
  0x56   :  { %473 = vmatprep.subr.bf16.mxu1 %v603_v6 }
  0x57   :  { %484 = vmatpush3.bf16.msra.mxu0 %v483_v60 }
  0x58   :  { %485 = vmatprep.subr.bf16.mxu0 %v603_v6 }
  0x59   :  { %475 = vmatpush3.bf16.msra.mxu1 %v474_v15 }
  0x5b   :  { %487 = vmatpush3.bf16.msra.mxu0 %v486_v63 }
 0x11e   :  { %v144_v16 = vpop.f32.mrb[0].mxu0 }
 0x11f   :  { %v149_v17 = vsel %vm148_vm2, %v144_v16, 0.0  ;;  %v425_v18 = vpop.f32.mrb[1].mxu0 }
 0x120   :  { %v150_v19 = vrot.slane %v149_v17, 4 }
 0x122   :  { %v151_v20 = vadd.f32 %v150_v19, %v149_v17 }
 0x124   :  { %v152_v21 = vrot.slane %v151_v20, 2 }
 0x126   :  { %v153_v22 = vadd.f32 %v152_v21, %v151_v20 }
 0x128   :  { %v154_v23 = vrot.slane %v153_v22, 1 }
 0x12a   :  { %v155_v24 = vadd.f32 %v154_v23, %v153_v22  ;;  %v296_v23 = vsub.s32 2, %v689_v38 }
 0x12c   :  { %v157_v25 = vmul.f32 0.125, %v155_v24 }
 0x12e   :  { %v158_v26 = vsub.f32 %v144_v16, %v157_v25 }
 0x130   :  { %v159_v27 = vmul.f32 %v158_v26, %v158_v26 }
 0x132   :  { %v160_v28 = vsel %vm148_vm2, %v159_v27, 0.0  ;;  %v301_v27 = vsub.s32 3, %v689_v38 }
 0x133   :  { %v161_v29 = vrot.slane %v160_v28, 4 }
 0x135   :  { %v162_v30 = vadd.f32 %v161_v29, %v160_v28 }
 0x137   :  { %v163_v31 = vrot.slane %v162_v30, 2 }
 0x139   :  { %v164_v32 = vadd.f32 %v163_v31, %v162_v30 }
 0x13b   :  { %v165_v33 = vrot.slane %v164_v32, 1 }
 0x13d   :  { %v166_v34 = vadd.f32 %v165_v33, %v164_v32  ;;  %v315_v33 = vsub.s32 4, %v689_v38 }
 0x13f   :  { %v167_v35 = vmul.f32 0.125, %v166_v34  ;;  %v316_v34 = vrot.slane %v694_v39, %v315_v33 }
 0x141   :  { %v168_v36 = vadd.f32 1e-05, %v167_v35 }
 0x143   :  { %497 = vrsqrt.f32 %v168_v36 }
 0x14d   :  { %v498_v40 = vpop.eup %497 }
 0x14e   :  { %v170_v41 = vmul.f32 %v498_v40, %v694_v39 }
 0x150   :  { %v171_v43 = vmul.f32 %v170_v41, %v157_v25  ;;  %v179_v45 = vrot.slane %v170_v41, %v178_v42 }
 0x152   :  { %v173_v44 = vrot.slane %v171_v43, 7  ;;  %v180_v48 = vmul.f32 %v179_v45, %v144_v16 }
 0x154   :  { %v175_v47 = vsub.f32 %v694_v39, %v173_v44 }
 0x156   :  { %v184_v49 = vrot.slane %v175_v47, %v183_v46 }
 0x158   :  { %v185_v50 = vadd.f32 %v184_v49, %v180_v48 }
 0x15a   :  { %v186_v51 = vmax.f32 %v185_v50, 0.0 }
 0x15c   :  { %443 = vmatmul.mubr.msk.f32.vlgmr.msra.gmra.mrb[0].mxu1 %vm148_vm2, %v186_v51 }
 0x22f   :  { %v264_v0 = vpop.f32.mrb[0].mxu1 }
 0x230   :  { %v268_v1 = vsel %vm148_vm2, %v264_v0, 0.0  ;;  %v444_v2 = vpop.f32.mrb[1].mxu1 }
 0x231   :  { %v269_v3 = vrot.slane %v268_v1, 4 }
 0x233   :  { %v270_v4 = vadd.f32 %v269_v3, %v268_v1 }
 0x235   :  { %v271_v5 = vrot.slane %v270_v4, 2 }
 0x237   :  { %v272_v7 = vadd.f32 %v271_v5, %v270_v4 }
 0x239   :  { %v273_v8 = vrot.slane %v272_v7, 1 }
 0x23b   :  { %v274_v9 = vadd.f32 %v273_v8, %v272_v7 }
 0x23d   :  { %v275_v10 = vmul.f32 0.125, %v274_v9 }
 0x23f   :  { %v276_v11 = vsub.f32 %v264_v0, %v275_v10 }
 0x241   :  { %v277_v12 = vmul.f32 %v276_v11, %v276_v11 }
 0x243   :  { %v278_v13 = vsel %vm148_vm2, %v277_v12, 0.0 }
 0x244   :  { %v279_v6 = vrot.slane %v278_v13, 4 }
 0x246   :  { %v280_v14 = vadd.f32 %v279_v6, %v278_v13 }
 0x248   :  { %v281_v15 = vrot.slane %v280_v14, 2 }
 0x24a   :  { %v282_v16 = vadd.f32 %v281_v15, %v280_v14 }
 0x24c   :  { %v283_v17 = vrot.slane %v282_v16, 1 }
 0x24e   :  { %v284_v18 = vadd.f32 %v283_v17, %v282_v16 }
 0x250   :  { %v285_v19 = vmul.f32 0.125, %v284_v18 }
 0x252   :  { %v286_v20 = vadd.f32 1e-05, %v285_v19 }
 0x254   :  { %499 = vrsqrt.f32 %v286_v20 }
 0x25e   :  { %v500_v21 = vpop.eup %499 }
 0x25f   :  { %v288_v22 = vmul.f32 %v500_v21, %v694_v39 }
 0x261   :  { %v289_v24 = vmul.f32 %v288_v22, %v275_v10  ;;  %v297_v26 = vrot.slane %v288_v22, %v296_v23 }
 0x263   :  { %v291_v25 = vrot.slane %v289_v24, 7  ;;  %v298_v29 = vmul.f32 %v297_v26, %v264_v0 }
 0x265   :  { %v293_v28 = vsub.f32 %v694_v39, %v291_v25 }
 0x267   :  { %v302_v30 = vrot.slane %v293_v28, %v301_v27 }
 0x269   :  { %v303_v31 = vadd.f32 %v302_v30, %v298_v29 }
 0x26b   :  { %v304_v32 = vmax.f32 %v303_v31, 0.0 }
 0x26d   :  { %462 = vmatmul.mubr.msk.f32.vlgmr.msra.gmra.mrb[2].mxu0 %vm148_vm2, %v304_v32 }
 0x340   :  { %v386_v35 = vpop.f32.mrb[2].mxu0 }
 0x341   :  { %v387_v36 = vadd.f32 %v386_v35, %v316_v34  ;;  %v463_v37 = vpop.f32.mrb[3].mxu0 }
 0x343   :  { %390 = vst [vmem:[%s721_s5] sm:$0xff] %v387_v36 }
 0x344   :  { %395 = vsyncpa [#allocation3], 1 }
 0x345   :  { %396 = vsyncpa [#allocation5], 1 }
 0x346   :  { %397 = vsyncpa [#allocation8], 1 }

</bundles_post_ra>
